<compile_context>
chip_gen: v6e
topology: v6e:2x2x1
jax: 0.10.0
libtpu: 0.0.40
codegen_flags: <defaults>
</compile_context>

<pallas_src>
import jax
import jax.numpy as jnp
from jax import lax
from jax.experimental import pallas as pl
from jax.experimental.pallas import tpu as pltpu


def actor_kernel(x_ref, vec_ref, w2_ref, w3_ref, o_ref):
    x = x_ref[...].astype(jnp.float32)              # (TB, 2)

    # Packed small vectors (one resident (8, H) tile):
    w1_r0 = vec_ref[0:1, :]                         # w1 row for x[:, 0]
    w1_r1 = vec_ref[1:2, :]                         # w1 row for x[:, 1]
    b1    = vec_ref[2:3, :]
    gamma = vec_ref[3:4, :]
    beta  = vec_ref[4:5, :]
    b2    = vec_ref[5:6, :]
    b3    = vec_ref[6:7, :]                         # padding lanes hold -1e30

    # --- Linear(2, H): K=2 -> two VPU FMAs, keep it off the MXU ------------
    h = x[:, 0:1] * w1_r0 + x[:, 1:2] * w1_r1 + b1  # (TB, H)

    # --- LayerNorm(H): two independent reductions (sum, sum of squares) ----
    H = h.shape[-1]
    inv_h = jnp.float32(1.0 / H)
    s1 = jnp.sum(h, axis=-1, keepdims=True)
    s2 = jnp.sum(h * h, axis=-1, keepdims=True)
    mu = s1 * inv_h
    var = jnp.maximum(s2 * inv_h - mu * mu, 0.0)
    h = (h - mu) * lax.rsqrt(var + 1e-5) * gamma + beta
    h = jnp.maximum(h, 0.0)                         # ReLU

    # --- Linear(H, H) + ReLU (bf16 operands, f32 accumulation on MXU) ------
    h = jnp.dot(h.astype(jnp.bfloat16), w2_ref[...],
                preferred_element_type=jnp.float32) + b2
    h = jnp.maximum(h, 0.0)

    # --- Linear(H, n_actions) padded to a lane-dense H-wide head -----------
    logits = jnp.dot(h.astype(jnp.bfloat16), w3_ref[...],
                     preferred_element_type=jnp.float32) + b3

    # --- LogSoftmax(-1); padding lanes are -1e30 so they are inert ---------
    m = jnp.max(logits, axis=-1, keepdims=True)
    lse = jnp.log(jnp.sum(jnp.exp(logits - m), axis=-1, keepdims=True)) + m
    o_ref[...] = (logits - lse).astype(o_ref.dtype)


def actor_forward(x, kernel_params, *, tile_b=512):
    """x: (B, 2) f32. Returns (B, n_actions) log-probs."""
    vec, w2_bf, w3_pad, n_actions = kernel_params
    H = w2_bf.shape[0]
    B = x.shape[0]

    # Batch tile: multiple of 8 sublanes, pad batch up to a tile multiple.
    tb = max(8, min(int(tile_b), ((B + 7) // 8) * 8))
    tb = ((tb + 7) // 8) * 8
    bp = ((B + tb - 1) // tb) * tb
    if bp != B:
        x = jnp.pad(x, ((0, bp - B), (0, 0)))
    grid = (bp // tb,)

    out_padded = pl.pallas_call(
        actor_kernel,
        out_shape=jax.ShapeDtypeStruct((bp, H), jnp.float32),
        grid=grid,
        in_specs=[
            pl.BlockSpec((tb, 2), lambda i: (i, 0)),   # activation tile (pipelined)
            pl.BlockSpec((8, H), lambda i: (0, 0)),    # packed vectors: resident
            pl.BlockSpec((H, H), lambda i: (0, 0)),    # w2 (bf16): resident
            pl.BlockSpec((H, H), lambda i: (0, 0)),    # w3 padded (bf16): resident
        ],
        out_specs=pl.BlockSpec((tb, H), lambda i: (i, 0)),  # lane-dense output
        compiler_params=pltpu.CompilerParams(
            dimension_semantics=("parallel",),          # batch shards across TCs (v7x)
        ),
    )(x, vec, w2_bf, w3_pad)

    return out_padded[:B, :n_actions]


def init_params(key, n_actions, hidden_size=128):
    """PyTorch-like uniform fan-in init; natural (module) layout, f32."""
    ks = jax.random.split(key, 6)

    def lin(kw, kb, fan_in, fan_out):
        bound = 1.0 / float(fan_in) ** 0.5
        w = jax.random.uniform(kw, (fan_in, fan_out), jnp.float32, -bound, bound)
        b = jax.random.uniform(kb, (fan_out,), jnp.float32, -bound, bound)
        return w, b

    w1, b1 = lin(ks[0], ks[1], 2, hidden_size)
    gamma = jnp.ones((hidden_size,), jnp.float32)      # LayerNorm weight
    beta = jnp.zeros((hidden_size,), jnp.float32)      # LayerNorm bias
    w2, b2 = lin(ks[2], ks[3], hidden_size, hidden_size)
    w3, b3 = lin(ks[4], ks[5], hidden_size, n_actions)
    return (w1, b1, gamma, beta, w2, b2, w3, b3)


def prepare_kernel_params(params, n_actions):
    """Pack module params into the kernel layout.

    Returns (vec(8,H) f32, w2(H,H) bf16, w3_padded(H,H) bf16, n_actions).
    """
    w1, b1, gamma, beta, w2, b2, w3, b3 = params
    H = w2.shape[0]
    assert H % 128 == 0 and 0 < n_actions <= H
    NEG = jnp.float32(-1e30)

    vec = jnp.zeros((8, H), jnp.float32)
    vec = vec.at[0].set(w1[0])
    vec = vec.at[1].set(w1[1])
    vec = vec.at[2].set(b1)
    vec = vec.at[3].set(gamma)
    vec = vec.at[4].set(beta)
    vec = vec.at[5].set(b2)
    b3_row = jnp.full((H,), NEG, jnp.float32).at[:n_actions].set(b3)
    vec = vec.at[6].set(b3_row)

    w2_bf = w2.astype(jnp.bfloat16)
    w3_pad = jnp.zeros((H, H), jnp.float32).at[:, :n_actions].set(w3)
    w3_pad = w3_pad.astype(jnp.bfloat16)
    return (vec, w2_bf, w3_pad, int(n_actions))


def actor_ref(x, params):
    """Pure-JAX f32 reference matching the PyTorch module."""
    w1, b1, gamma, beta, w2, b2, w3, b3 = params
    h = x @ w1 + b1
    mu = jnp.mean(h, axis=-1, keepdims=True)
    var = jnp.mean((h - mu) ** 2, axis=-1, keepdims=True)
    h = (h - mu) * lax.rsqrt(var + 1e-5) * gamma + beta
    h = jnp.maximum(h, 0.0)
    h = jnp.maximum(h @ w2 + b2, 0.0)
    logits = h @ w3 + b3
    return jax.nn.log_softmax(logits, axis=-1)


if __name__ == "__main__":
    key = jax.random.PRNGKey(0)
    k_x, k_p = jax.random.split(key)

    B, n_actions, hidden = 64, 4, 128
    x = jax.random.normal(k_x, (B, 2), jnp.float32)     # state: [batch, 2]
    params = init_params(k_p, n_actions, hidden)
    kparams = prepare_kernel_params(params, n_actions)

    # tile_b=16 -> grid=(4,): exercises the batch grid / double-buffering.
    out = actor_forward(x, kparams, tile_b=16)
    out = jax.block_until_ready(out)

    ref = actor_ref(x, params)
    assert out.shape == (B, n_actions)
    # bf16 MXU operands (f32 accumulation) => loosened tolerance vs f32 ref.
    assert jnp.allclose(out, ref, atol=5e-2, rtol=5e-2), "mismatch vs reference"
    # log-softmax rows must sum (in prob space) to ~1
    assert jnp.allclose(jnp.sum(jnp.exp(out), axis=-1), 1.0, atol=1e-3)

    print("KERNEL_OK")
</pallas_src>

<mosaic_0001>
module attributes {stable_mosaic.version = 11 : i64} {
  func.func @actor_kernel(%arg0: i32, %arg1: memref<16x2xf32, #tpu.memory_space<vmem>>, %arg2: memref<8x128xf32, #tpu.memory_space<vmem>>, %arg3: memref<128x128xbf16, #tpu.memory_space<vmem>>, %arg4: memref<128x128xbf16, #tpu.memory_space<vmem>>, %arg5: memref<16x128xf32, #tpu.memory_space<vmem>>) attributes {dimension_semantics = [#tpu.dimension_semantics<parallel>], iteration_bounds = array<i64: 4>, scalar_prefetch = 0 : i64, scratch_operands = 0 : i64, tpu.core_type = #tpu.core_type<tc>, window_params = [{transform_indices = @transform_0, window_bounds = array<i64: 16, 2>}, {pipeline_mode = #tpu.pipeline_mode<synchronous>, transform_indices = @transform_1, window_bounds = array<i64: 8, 128>}, {pipeline_mode = #tpu.pipeline_mode<synchronous>, transform_indices = @transform_2, window_bounds = array<i64: 128, 128>}, {pipeline_mode = #tpu.pipeline_mode<synchronous>, transform_indices = @transform_3, window_bounds = array<i64: 128, 128>}, {transform_indices = @transform_4, window_bounds = array<i64: 16, 128>}]} {
    %c0 = arith.constant 0 : index
    %c0_0 = arith.constant 0 : index
    %0 = vector.load %arg1[%c0, %c0_0] : memref<16x2xf32, #tpu.memory_space<vmem>>, vector<16x2xf32>
    %c0_1 = arith.constant 0 : index
    %c0_2 = arith.constant 0 : index
    %1 = vector.load %arg2[%c0_1, %c0_2] : memref<8x128xf32, #tpu.memory_space<vmem>>, vector<1x128xf32>
    %c1 = arith.constant 1 : index
    %c0_3 = arith.constant 0 : index
    %2 = vector.load %arg2[%c1, %c0_3] : memref<8x128xf32, #tpu.memory_space<vmem>>, vector<1x128xf32>
    %c2 = arith.constant 2 : index
    %c0_4 = arith.constant 0 : index
    %3 = vector.load %arg2[%c2, %c0_4] : memref<8x128xf32, #tpu.memory_space<vmem>>, vector<1x128xf32>
    %c3 = arith.constant 3 : index
    %c0_5 = arith.constant 0 : index
    %4 = vector.load %arg2[%c3, %c0_5] : memref<8x128xf32, #tpu.memory_space<vmem>>, vector<1x128xf32>
    %c4 = arith.constant 4 : index
    %c0_6 = arith.constant 0 : index
    %5 = vector.load %arg2[%c4, %c0_6] : memref<8x128xf32, #tpu.memory_space<vmem>>, vector<1x128xf32>
    %c5 = arith.constant 5 : index
    %c0_7 = arith.constant 0 : index
    %6 = vector.load %arg2[%c5, %c0_7] : memref<8x128xf32, #tpu.memory_space<vmem>>, vector<1x128xf32>
    %c6 = arith.constant 6 : index
    %c0_8 = arith.constant 0 : index
    %7 = vector.load %arg2[%c6, %c0_8] : memref<8x128xf32, #tpu.memory_space<vmem>>, vector<1x128xf32>
    %8 = vector.extract_strided_slice %0 {offsets = [0, 0], sizes = [16, 1], strides = [1, 1]} : vector<16x2xf32> to vector<16x1xf32>
    %9 = vector.broadcast %8 : vector<16x1xf32> to vector<16x128xf32>
    %10 = vector.broadcast %1 : vector<1x128xf32> to vector<16x128xf32>
    %11 = arith.mulf %9, %10 : vector<16x128xf32>
    %12 = vector.extract_strided_slice %0 {offsets = [0, 1], sizes = [16, 1], strides = [1, 1]} : vector<16x2xf32> to vector<16x1xf32>
    %13 = vector.broadcast %12 : vector<16x1xf32> to vector<16x128xf32>
    %14 = vector.broadcast %2 : vector<1x128xf32> to vector<16x128xf32>
    %15 = arith.mulf %13, %14 : vector<16x128xf32>
    %16 = arith.addf %11, %15 : vector<16x128xf32>
    %17 = vector.broadcast %3 : vector<1x128xf32> to vector<16x128xf32>
    %18 = arith.addf %16, %17 : vector<16x128xf32>
    %cst = arith.constant dense<0.000000e+00> : vector<16xf32>
    %19 = vector.multi_reduction <add>, %18, %cst [1] : vector<16x128xf32> to vector<16xf32>
    %20 = vector.shape_cast %19 : vector<16xf32> to vector<16x1xf32>
    %21 = arith.mulf %18, %18 : vector<16x128xf32>
    %cst_9 = arith.constant dense<0.000000e+00> : vector<16xf32>
    %22 = vector.multi_reduction <add>, %21, %cst_9 [1] : vector<16x128xf32> to vector<16xf32>
    %23 = vector.shape_cast %22 : vector<16xf32> to vector<16x1xf32>
    %cst_10 = arith.constant 7.812500e-03 : f32
    %24 = vector.broadcast %cst_10 : f32 to vector<16x1xf32>
    %25 = arith.mulf %20, %24 : vector<16x1xf32>
    %cst_11 = arith.constant 7.812500e-03 : f32
    %26 = vector.broadcast %cst_11 : f32 to vector<16x1xf32>
    %27 = arith.mulf %23, %26 : vector<16x1xf32>
    %28 = arith.mulf %25, %25 : vector<16x1xf32>
    %29 = arith.subf %27, %28 : vector<16x1xf32>
    %cst_12 = arith.constant 0.000000e+00 : f32
    %30 = vector.broadcast %cst_12 : f32 to vector<16x1xf32>
    %31 = arith.maximumf %29, %30 : vector<16x1xf32>
    %32 = vector.broadcast %25 : vector<16x1xf32> to vector<16x128xf32>
    %33 = arith.subf %18, %32 : vector<16x128xf32>
    %cst_13 = arith.constant 9.99999974E-6 : f32
    %34 = vector.broadcast %cst_13 : f32 to vector<16x1xf32>
    %35 = arith.addf %31, %34 : vector<16x1xf32>
    %36 = math.rsqrt %35 : vector<16x1xf32>
    %37 = vector.broadcast %36 : vector<16x1xf32> to vector<16x128xf32>
    %38 = arith.mulf %33, %37 : vector<16x128xf32>
    %39 = vector.broadcast %4 : vector<1x128xf32> to vector<16x128xf32>
    %40 = arith.mulf %38, %39 : vector<16x128xf32>
    %41 = vector.broadcast %5 : vector<1x128xf32> to vector<16x128xf32>
    %42 = arith.addf %40, %41 : vector<16x128xf32>
    %cst_14 = arith.constant 0.000000e+00 : f32
    %43 = vector.broadcast %cst_14 : f32 to vector<16x128xf32>
    %44 = arith.maximumf %42, %43 : vector<16x128xf32>
    %45 = arith.truncf %44 : vector<16x128xf32> to vector<16x128xbf16>
    %c0_15 = arith.constant 0 : index
    %c0_16 = arith.constant 0 : index
    %46 = vector.load %arg3[%c0_15, %c0_16] : memref<128x128xbf16, #tpu.memory_space<vmem>>, vector<128x128xbf16>
    %cst_17 = arith.constant dense<0.000000e+00> : vector<16x128xf32>
    %47 = tpu.matmul %45, %46, %cst_17 {dimension_numbers = #tpu.dot_dimension_numbers<[1], [0], [0], [1], [0, 0, 1, 1], [], []>} : vector<16x128xbf16>, vector<128x128xbf16>, vector<16x128xf32> -> vector<16x128xf32>
    %48 = vector.broadcast %6 : vector<1x128xf32> to vector<16x128xf32>
    %49 = arith.addf %47, %48 : vector<16x128xf32>
    %cst_18 = arith.constant 0.000000e+00 : f32
    %50 = vector.broadcast %cst_18 : f32 to vector<16x128xf32>
    %51 = arith.maximumf %49, %50 : vector<16x128xf32>
    %52 = arith.truncf %51 : vector<16x128xf32> to vector<16x128xbf16>
    %c0_19 = arith.constant 0 : index
    %c0_20 = arith.constant 0 : index
    %53 = vector.load %arg4[%c0_19, %c0_20] : memref<128x128xbf16, #tpu.memory_space<vmem>>, vector<128x128xbf16>
    %cst_21 = arith.constant dense<0.000000e+00> : vector<16x128xf32>
    %54 = tpu.matmul %52, %53, %cst_21 {dimension_numbers = #tpu.dot_dimension_numbers<[1], [0], [0], [1], [0, 0, 1, 1], [], []>} : vector<16x128xbf16>, vector<128x128xbf16>, vector<16x128xf32> -> vector<16x128xf32>
    %55 = vector.broadcast %7 : vector<1x128xf32> to vector<16x128xf32>
    %56 = arith.addf %54, %55 : vector<16x128xf32>
    %cst_22 = arith.constant dense<0xFF800000> : vector<16xf32>
    %57 = vector.multi_reduction <maximumf>, %56, %cst_22 [1] : vector<16x128xf32> to vector<16xf32>
    %58 = vector.shape_cast %57 : vector<16xf32> to vector<16x1xf32>
    %59 = vector.broadcast %58 : vector<16x1xf32> to vector<16x128xf32>
    %60 = arith.subf %56, %59 : vector<16x128xf32>
    %61 = math.exp %60 : vector<16x128xf32>
    %cst_23 = arith.constant dense<0.000000e+00> : vector<16xf32>
    %62 = vector.multi_reduction <add>, %61, %cst_23 [1] : vector<16x128xf32> to vector<16xf32>
    %63 = vector.shape_cast %62 : vector<16xf32> to vector<16x1xf32>
    %64 = math.log %63 : vector<16x1xf32>
    %65 = arith.addf %64, %58 : vector<16x1xf32>
    %66 = vector.broadcast %65 : vector<16x1xf32> to vector<16x128xf32>
    %67 = arith.subf %56, %66 : vector<16x128xf32>
    %c0_24 = arith.constant 0 : index
    %c0_25 = arith.constant 0 : index
    %68 = vector.load %arg5[%c0_24, %c0_25] : memref<16x128xf32, #tpu.memory_space<vmem>>, vector<16x128xf32>
    tpu.vector_store %arg5[%c0_24, %c0_25], %67 {strides = array<i32>} : memref<16x128xf32, #tpu.memory_space<vmem>>, vector<16x128xf32>,
    return
  }
  func.func @transform_0(%arg0: i32) -> (i32, i32) {
    %c0_i32 = arith.constant 0 : i32
    %c0_i32_0 = arith.constant 0 : i32
    return %arg0, %c0_i32 : i32, i32
  }
  func.func @transform_1(%arg0: i32) -> (i32, i32) {
    %c0_i32 = arith.constant 0 : i32
    %c0_i32_0 = arith.constant 0 : i32
    %c0_i32_1 = arith.constant 0 : i32
    return %c0_i32, %c0_i32_0 : i32, i32
  }
  func.func @transform_2(%arg0: i32) -> (i32, i32) {
    %c0_i32 = arith.constant 0 : i32
    %c0_i32_0 = arith.constant 0 : i32
    %c0_i32_1 = arith.constant 0 : i32
    return %c0_i32, %c0_i32_0 : i32, i32
  }
  func.func @transform_3(%arg0: i32) -> (i32, i32) {
    %c0_i32 = arith.constant 0 : i32
    %c0_i32_0 = arith.constant 0 : i32
    %c0_i32_1 = arith.constant 0 : i32
    return %c0_i32, %c0_i32_0 : i32, i32
  }
  func.func @transform_4(%arg0: i32) -> (i32, i32) {
    %c0_i32 = arith.constant 0 : i32
    %c0_i32_0 = arith.constant 0 : i32
    return %arg0, %c0_i32 : i32, i32
  }
}

</mosaic_0001>

<bundles_post_ra>
// kernel: tpu_custom_call.1
= control target key start
LH: loop header
LB: loop body
LE: loop exit
PB: predicated region body
PF: predicated region fallthrough
CT: control target
= control target key end

     0   :  { %9 = vsyncpa [#allocation3], 0  ;;  %s1212_s0 = inlined_call_operand.vmem [shape: f32[64,2], index: 0, kind: input, shape index: {}]   ;;  %s1213_s1 = inlined_call_operand.hbm [shape: f32[8,128], index: 1, kind: input, shape index: {}]   ;;  %s1214_s2 = inlined_call_operand.vmem [shape: bf16[128,128], index: 2, kind: input, shape index: {}]   ;;  %s1215_s3 = inlined_call_operand.hbm [shape: bf16[128,128], index: 3, kind: input, shape index: {}]   ;;  %s1216_s4 = inlined_call_operand.hbm [shape: f32[64,128], index: 4, kind: output, shape index: {}]  }
   0x1   :  { %10 = vsyncpa [#allocation6], 0 }
   0x2   :  { %11 = vsyncpa [#allocation4], 0 }
   0x3   :  { %13 = vsyncpa [#allocation4 + $0x1], 0  ;;  %s1016_s15 = smov 0   ;;  %s1018_s16 = smov 0  }
   0x4   :  { %s1020_s17 = smov 0   ;;  %s1022_s18 = smov 0  }
   0x5 LB: > { %s1037_s19 = sadd.s32 4294967295, %s978_s18   ;;  %s661_s20 = sadd.s32 4294967294, %s978_s18   ;;  %s978_s18 = sphi %s1022_s18, %s1234_s18   ;;  %s974_s17 = sphi %s1020_s17, %s1233_s17   ;;  %s970_s16 = sphi %s1018_s16, %s1232_s16   ;;  %s966_s15 = sphi %s1016_s15, %s1231_s15  }
   0x6   : > { %s1041_s21 = sadd.s32 1, %s978_s18   ;;  %s115_s22 = sadd.s32 1, %s974_s17 }
   0x7   : > { %s112_s23 = ssub.s32 %s978_s18, %s1041_s21  ;;  %p125_p0 = scmp.ne.s32.totalorder %s974_s17, %s970_s16 }
   0x8   : > { %p113_p1 = scmp.eq.s32.totalorder %s112_s23, 0  ;;  %p126_p2 = scmp.eq.s32.totalorder %s1037_s19, 3 }
   0x9   : > { %p131_p3 = scmp.ne.s32.totalorder %s970_s16, %s966_s15  ;;  %p132_p4 = scmp.eq.s32.totalorder %s661_s20, 3 }
   0xa   : > { %s1052_s24 = scalar_select %p113_p1, %s974_s17, %s115_s22  }
   0xb   : > { %p1054_p5 = por %p126_p2, %p125_p0  ;;  %p1058_p6 = por %p132_p4, %p131_p3 }
   0xc   : > { %p662_p7 = scmp.ge.s32.totalorder %s978_s18, 1  ;;  %p139_p8 = scmp.lt.s32.totalorder %s978_s18, 5 }
   0xd   : > { %s1220_s25 = scalar_select %p1054_p5, 1, 0 }
   0xe   : > { %s1221_s26 = scalar_select %p1058_p6, 1, 0 }
   0xf   : > { %p1217_p9 = scmp.eq.s32.totalorder %s1037_s19, 0  ;;  %p1065_p10 = pnand %p662_p7, %p139_p8 }
  0x10   : > { %s980_s28 = smov [#allocation2]   ;;  %s981_s30 = smov [#allocation5]  }
  0x11   : > { %s1222_s27 = scalar_select %p1065_p10, 1, 0 }
  0x12   : > { %s152_s29 = sshll.u32 %s980_s28, 4  ;;  %p769_p11 = pneg %p1065_p10  ;;  %s153_s29 = int_to_ptr.vmem [resolvable:$true] %s152_s29 }
  0x13   : > { %s165_s5 = sshll.u32 %s981_s30, 4  ;;  %s869_s7 = scalar_lea.vmem %s153_s29, 128  ;;  %s166_s5 = int_to_ptr.vmem [resolvable:$true] %s165_s5 }
  0x14   : > { %p1073_p12 = pnand %p1217_p9, %p769_p11  ;;  %p870_p0 = scmp.ne.s32.totalorder %s153_s29, %s869_s7 }
  0x15   : > { %p877_p3 = scmp.lt.s32.totalorder %s153_s29, %s153_s29  ;;  %p878_p4 = scmp.lt.s32.totalorder %s869_s7, %s869_s7 }
  0x16   : > { %p860_p13 = pneg %p1073_p12 }
  0x17   : > { %p879_p7 = por %p878_p4, %p877_p3 }
  0x18   : > { %p872_p1 = pnand %p870_p0, %p860_p13 }
  0x1a   : > { %p873_p2 = pneg %p872_p1 }
  0x1c   : > { %p880_p8 = pnand %p879_p7, %p873_p2 }
  0x1e   : > { %883 = shalt.err (!%p880_p8)
}
  0x1f   : > { %772 = dma.hbm_to_vmem [thread:$0]  (!%p1073_p12), %s1213_s1, 128, %s153_s29, [#allocation3]  }
  0x20   : > { %s895_s10 = scalar_lea.vmem %s166_s5, 1024  ;;  %p903_p0 = scmp.lt.s32.totalorder %s166_s5, %s166_s5 }
  0x21   : > { %p896_p11 = scmp.ne.s32.totalorder %s166_s5, %s895_s10  ;;  %p904_p1 = scmp.lt.s32.totalorder %s895_s10, %s895_s10 }
  0x23   : > { %p898_p9 = pnand %p896_p11, %p860_p13  ;;  %p905_p5 = por %p904_p1, %p903_p0 }
  0x25   : > { %p899_p6 = pneg %p898_p9 }
  0x27   : > { %p906_p10 = pnand %p905_p5, %p899_p6 }
  0x29   : > { %909 = shalt.err (!%p906_p10)
}
  0x2a   : > { %s982_s11 = smov 64   ;;  %s983_s12 = smov 4  }
  0x2b   : > { %775 = dma.hbm_to_vmem [thread:$0]  (!%p1073_p12), %s1215_s3, 1024, %s166_s5, [#allocation6], %s982_s11, %s982_s11, %s983_s12  }
  0x2c   : > { %p1224_p2 = scmp.ne.s32.totalorder %s1222_s27, 0 }
  0x2d   : > { %p1225_p3 = scmp.eq.s32.totalorder (!%p1224_p2), %s1037_s19, 0 }
  0x2e   : > { %190 = sbr.rel (%p1224_p2) target bundleno = 1100 (0x44c), region = 36 }
  0x33   : > { %953 = dma.done.wait (%p1225_p3), [#allocation3], 128   ;;  %p1226_p9 = pmov %p1225_p3 }
  0x34   : > { %p1227_p5 = pmov %p1225_p3 }
  0x35   : > { %955 = vsyncadd (%p1226_p9), [#allocation3], 4294967168 }
  0x36   : > { %957 = dma.done.wait (%p1227_p5), [#allocation6], 1024   ;;  %p1228_p6 = pmov %p1225_p3 }
  0x37   : > { %s670_s20 = sshll.u32 %s1037_s19, 1  ;;  %v984_v0 = vmov 1   ;;  %v985_v1 = vmov 0   ;;  %v673_v4 = vld [vmem:[#allocation2 + $0x1] ss:$0 sm:$0xff]  ;;  %v830_v21 = vld [vmem:[%s1214_s2 + $0x38] sm:$0xff]  }
  0x38   : > { %959 = vsyncadd (%p1228_p6), [#allocation6], 4294966272  ;;  %828 = vset.pattern.permute.xlu1 %v984_v0  ;;  %827 = vset.pattern.permute.xlu0 %v985_v1  ;;  %p221_p10 = scmp.lt.s32.totalorder %s670_s20, 7  ;;  %v672_v5 = vld [vmem:[#allocation2] ss:$0 sm:$0xff]  ;;  %v986_v22 = vmov 0.0  }
  0x39   : > { %v674_v10 = vld [vmem:[#allocation2 + $0x2] ss:$0 sm:$0xff]  ;;  %719 = vmatprep.subr.bf16.mxu0 %v986_v22  ;;  %739 = vmatprep.subr.bf16.mxu1 %v986_v22  ;;  %v831_v23 = vld [vmem:[%s1214_s2 + $0x30] sm:$0xff]   ;;  %v832_v24 = vld [vmem:[%s1214_s2 + $0x28] sm:$0xff]   ;;  %vm987_vm0 = vmmov 0   ;;  %s700_s30 = sshll.u32 %s1037_s19, 8 }
  0x3a   : > { %s1236_s20 = smov (!%p221_p10, %s670_s20), 7  ;;  %720 = vmatpush3.bf16.msra.mxu0 %v830_v21  ;;  %v833_v25 = vld [vmem:[%s1214_s2 + $0x20] sm:$0xff]   ;;  %735 = vmatprep.mubr.msk.bf16.mxu0 %vm987_vm0, %v986_v22  ;;  %v834_v26 = vld [vmem:[%s1214_s2 + $0x18] sm:$0xff]   ;;  %v835_v27 = vld [vmem:[%s1214_s2 + $0x10] sm:$0xff]   ;;  %s1168_s9 = scalar_lea.hbm %s1216_s4, %s700_s30 }
  0x3b   : > { %s671_s22 = sshll.u32 %s1236_s20, 3  ;;  %721 = vmatprep.subr.bf16.mxu0 %v986_v22  ;;  %755 = vmatprep.mubr.msk.bf16.mxu1 %vm987_vm0, %v986_v22  ;;  %v836_v28 = vld [vmem:[%s1214_s2 + $0x8] sm:$0xff]   ;;  %v837_v29 = vld [vmem:[%s1214_s2] sm:$0xff]   ;;  %v839_v31 = vld [vmem:[#allocation5 + $0x30] sm:$0xff]   ;;  %p1229_p13 = scmp.ne.s32.totalorder %s1220_s25, 0 }
  0x3c   : > { %s224_s28 = scalar_lea.vmem %s1212_s0, %s671_s22  ;;  %v838_v30 = vld [vmem:[#allocation5 + $0x38] sm:$0xff]   ;;  %v840_v32 = vld [vmem:[#allocation5 + $0x28] sm:$0xff]   ;;  %v841_v33 = vld [vmem:[#allocation5 + $0x20] sm:$0xff]   ;;  %s988_s19 = smov [#allocation7]  }
  0x3d   : > { %v228_v2 = vld [vmem:[%s224_s28] sm:$0xff]  ;;  %v229_v3 = vld [vmem:[%s224_s28 + $0x8] sm:$0xff]  ;;  %740 = vmatpush3.bf16.msra.mxu1 %v838_v30  ;;  %s217_s28 = sand.u32 1, %s970_s16   ;;  %s914_s12 = sshll.u32 %s988_s19, 4  ;;  %s915_s12 = int_to_ptr.vmem [resolvable:$false] %s914_s12 }
  0x3e   : > { %254 = vperm.xlu1 %828, %v228_v2   ;;  %239 = vperm.xlu0 %827, %v228_v2   ;;  %v842_v34 = vld [vmem:[#allocation5 + $0x18] sm:$0xff]   ;;  %v843_v2 = vld [vmem:[#allocation5 + $0x10] sm:$0xff]   ;;  %s669_s29 = sshll.u32 %s217_s28, 4  ;;  %s1172_s10 = scalar_lea.sflag [#allocation4], %s217_s28 }
  0x3f   : > { %722 = vmatpush3.bf16.msra.mxu0 %v831_v23  ;;  %741 = vmatprep.subr.bf16.mxu1 %v986_v22  ;;  %v675_v53 = vld [vmem:[#allocation2 + $0x3] ss:$0 sm:$0xff]  ;;  %v676_v58 = vld [vmem:[#allocation2 + $0x4] ss:$0 sm:$0xff]  ;;  %s219_s5 = scalar_lea.vmem [#allocation7], %s669_s29  ;;  %s916_s13 = scalar_lea.vmem %s915_s12, 512 }
  0x40   : > { %723 = vmatprep.subr.bf16.mxu0 %v986_v22  ;;  %s577_s6 = sshll.u32 %s219_s5, 4  ;;  %s1170_s6 = int_to_ptr.vmem [resolvable:$true] %s577_s6 }
  0x41   : > { %742 = vmatpush3.bf16.msra.mxu1 %v839_v31  ;;  %s910_s11 = scalar_lea.vmem %s1170_s6, 256  ;;  %p917_p8 = scmp.lt.s32.totalorder %s1170_s6, %s915_s12 }
  0x42   : > { %258 = vperm.xlu1 %828, %v229_v3   ;;  %244 = vperm.xlu0 %827, %v229_v3   ;;  %v844_v3 = vld [vmem:[#allocation5 + $0x8] sm:$0xff]   ;;  %p911_p12 = scmp.ne.s32.totalorder %s1170_s6, %s910_s11  ;;  %p918_p11 = scmp.lt.s32.totalorder %s916_s13, %s910_s11 }
  0x43   : > { %724 = vmatpush3.bf16.msra.mxu0 %v832_v24  ;;  %743 = vmatprep.subr.bf16.mxu1 %v986_v22 }
  0x44   : > { %725 = vmatprep.subr.bf16.mxu0 %v986_v22  ;;  %p912_p4 = pnand %p911_p12, %p1229_p13  ;;  %p919_p0 = por %p918_p11, %p917_p8 }
  0x45   : > { %744 = vmatpush3.bf16.msra.mxu1 %v840_v32 }
  0x46   : > { %829 = vset.pattern.permute.xlu0 %v984_v0  ;;  %745 = vmatprep.subr.bf16.mxu1 %v986_v22  ;;  %p913_p7 = pneg %p912_p4 }
  0x47   : > { %726 = vmatpush3.bf16.msra.mxu0 %v833_v25 }
  0x48   : > { %727 = vmatprep.subr.bf16.mxu0 %v986_v22  ;;  %p920_p1 = pnand %p919_p0, %p913_p7 }
  0x49   : > { %746 = vmatpush3.bf16.msra.mxu1 %v841_v33 }
  0x4a   : > { %747 = vmatprep.subr.bf16.mxu1 %v986_v22 }
  0x4b   : > { %728 = vmatpush3.bf16.msra.mxu0 %v834_v26 }
  0x4c   : > { %729 = vmatprep.subr.bf16.mxu0 %v986_v22 }
  0x4d   : > { %748 = vmatpush3.bf16.msra.mxu1 %v842_v34 }
  0x4e   : > { %749 = vmatprep.subr.bf16.mxu1 %v986_v22 }
  0x4f   : > { %730 = vmatpush3.bf16.msra.mxu0 %v835_v27 }
  0x50   : > { %731 = vmatprep.subr.bf16.mxu0 %v986_v22 }
  0x51   : > { %750 = vmatpush3.bf16.msra.mxu1 %v843_v2 }
  0x52   : > { %751 = vmatprep.subr.bf16.mxu1 %v986_v22 }
  0x53   : > { %732 = vmatpush3.bf16.msra.mxu0 %v836_v28 }
  0x54   : > { %733 = vmatprep.subr.bf16.mxu0 %v986_v22 }
  0x55   : > { %752 = vmatpush3.bf16.msra.mxu1 %v844_v3 }
  0x56   : > { %753 = vmatprep.subr.bf16.mxu1 %v986_v22 }
  0x57   : > { %734 = vmatpush3.bf16.msra.mxu0 %v837_v29 }
  0xb9   : > { %v255_v6 = vpop.permute.xlu1 %254  ;;  %v240_v7 = vpop.permute.xlu0 %239 }
  0xba   : > { %v265_v8 = vmul.f32 %v673_v4, %v255_v6  ;;  %v251_v9 = vmul.f32 %v672_v5, %v240_v7 }
  0xbc   : > { %v267_v11 = vadd.f32 %v265_v8, %v251_v9 }
  0xbd   : > { %v259_v12 = vpop.permute.xlu1 %258  ;;  %v245_v13 = vpop.permute.xlu0 %244 }
  0xbe   : > { %v266_v14 = vmul.f32 %v673_v4, %v259_v12  ;;  %v252_v15 = vmul.f32 %v672_v5, %v245_v13  ;;  %v1109_v16 = vadd.f32 %v674_v10, %v267_v11  ;;  %v845_v4 = vld [vmem:[#allocation5] sm:$0xff]   ;;  %v677_v5 = vld [vmem:[#allocation2 + $0x5] ss:$0 sm:$0xff] }
  0xbf   : > { %754 = vmatpush3.bf16.msra.mxu1 %v845_v4 }
  0xc0   : > { %v268_v17 = vadd.f32 %v266_v14, %v252_v15  ;;  %275 = vadd.xlane.f32.xlu0 %v1109_v16  ;;  %v279_v18 = vmul.f32 %v1109_v16, %v1109_v16  ;;  %v686_v15 = vld [vmem:[#allocation2 + $0x6] ss:$0 sm:$0xff] }
  0xc2   : > { %v1114_v19 = vadd.f32 %v674_v10, %v268_v17 }
  0xc4   : > { %281 = vadd.xlane.f32.xlu0 %v279_v18  ;;  %277 = vadd.xlane.f32.xlu1 %v1114_v19  ;;  %v280_v20 = vmul.f32 %v1114_v19, %v1114_v19 }
  0xc8   : > { %283 = vadd.xlane.f32.xlu0 %v280_v20 }
 0x149   : > { %v276_v35 = vpop.xlane.xlu0 %275 }
 0x14a   : > { %v285_v36 = vmul.f32 0.0078125, %v276_v35 }
 0x14c   : > { %v289_v39 = vmul.f32 %v285_v36, %v285_v36  ;;  %v295_v51 = vsub.f32 %v1109_v16, %v285_v36 }
 0x14d   : > { %v278_v37 = vpop.xlane.xlu1 %277  ;;  %v282_v38 = vpop.xlane.xlu0 %281 }
 0x14e   : > { %v286_v40 = vmul.f32 0.0078125, %v278_v37  ;;  %v287_v41 = vmul.f32 0.0078125, %v282_v38 }
 0x150   : > { %v291_v42 = vsub.f32 %v287_v41, %v289_v39  ;;  %v290_v44 = vmul.f32 %v286_v40, %v286_v40  ;;  %v296_v55 = vsub.f32 %v1114_v19, %v286_v40 }
 0x151   : > { %v284_v43 = vpop.xlane.xlu0 %283 }
 0x152   : > { %v293_v45 = vmax.f32 %v291_v42, 0.0  ;;  %v288_v46 = vmul.f32 0.0078125, %v284_v43 }
 0x154   : > { %v297_v47 = vadd.f32 1e-05, %v293_v45  ;;  %v292_v48 = vsub.f32 %v288_v46, %v290_v44 }
 0x156   : > { %846 = vrsqrt.f32 %v297_v47  ;;  %v294_v49 = vmax.f32 %v292_v48, 0.0 }
 0x158   : > { %v298_v50 = vadd.f32 1e-05, %v294_v49 }
 0x15a   : > { %848 = vrsqrt.f32 %v298_v50 }
 0x163   : > { %v847_v52 = vpop.eup %846 }
 0x164   : > { %v301_v54 = vmul.f32 %v847_v52, %v295_v51 }
 0x166   : > { %v307_v56 = vmul.f32 %v675_v53, %v301_v54 }
 0x167   : > { %v849_v57 = vpop.eup %848 }
 0x168   : > { %v302_v59 = vmul.f32 %v849_v57, %v296_v55  ;;  %v313_v61 = vadd.f32 %v676_v58, %v307_v56 }
 0x16a   : > { %v308_v60 = vmul.f32 %v675_v53, %v302_v59  ;;  %v315_v63 = vmax.f32 %v313_v61, 0.0 }
 0x16c   : > { %v314_v62 = vadd.f32 %v676_v58, %v308_v60 }
 0x16e   : > { %v316_v0 = vmax.f32 %v314_v62, 0.0 }
 0x170   : > { %v317_v1 = vpack.c.bf16 %v316_v0, %v315_v63 }
 0x172   : > { %736 = vmatmul.mubr.bf16.vlgmr.msra.gmra.mxu0 %v317_v1 }
 0x232   : > { %v420_v6 = vpop.f32.mrf.mxu0 }
 0x233   : > { %v421_v8 = vadd.f32 %v677_v5, %v420_v6 }
 0x234   : > { %v737_v7 = vpop.f32.mrf.mxu0 }
 0x235   : > { %v427_v12 = vmax.f32 %v421_v8, 0.0 }
 0x236   : > { %v423_v9 = vpop.f32.mrf.mxu0 }
 0x237   : > { %v424_v10 = vadd.f32 %v677_v5, %v423_v9 }
 0x238   : > { %v738_v11 = vpop.f32.mrf.mxu0 }
 0x239   : > { %v428_v13 = vmax.f32 %v424_v10, 0.0 }
 0x23b   : > { %v429_v14 = vpack.c.bf16 %v428_v13, %v427_v12 }
 0x23d   : > { %756 = vmatmul.mubr.bf16.vlgmr.msra.gmra.mxu1 %v429_v14 }
 0x2fd   : > { %v532_v16 = vpop.f32.mrf.mxu1 }
 0x2fe   : > { %v533_v17 = vadd.f32 %v686_v15, %v532_v16 }
 0x2ff   : > { %v757_v18 = vpop.f32.mrf.mxu1 }
 0x300   : > { %539 = vmax.xlane.f32.xlu1 %v533_v17 }
 0x301   : > { %v535_v19 = vpop.f32.mrf.mxu1 }
 0x302   : > { %v536_v20 = vadd.f32 %v686_v15, %v535_v19 }
 0x303   : > { %v758_v21 = vpop.f32.mrf.mxu1 }
 0x304   : > { %541 = vmax.xlane.f32.xlu0 %v536_v20 }
 0x389   : > { %v540_v22 = vpop.xlane.xlu1 %539 }
 0x38a   : > { %v543_v23 = vsub.f32 %v533_v17, %v540_v22 }
 0x38c   : > { %v545_v24 = vmul.f32 1.442695, %v543_v23 }
 0x38d   : > { %v542_v25 = vpop.xlane.xlu0 %541 }
 0x38e   : > { %850 = vpow2.f32 %v545_v24  ;;  %v544_v26 = vsub.f32 %v536_v20, %v542_v25 }
 0x390   : > { %v547_v27 = vmul.f32 1.442695, %v544_v26 }
 0x392   : > { %852 = vpow2.f32 %v547_v27 }
 0x39b   : > { %v851_v28 = vpop.eup %850 }
 0x39c   : > { %549 = vadd.xlane.f32.xlu1 %v851_v28 }
 0x39f   : > { %v853_v29 = vpop.eup %852 }
 0x3a0   : > { %551 = vadd.xlane.f32.xlu0 %v853_v29 }
 0x425   : > { %v550_v30 = vpop.xlane.xlu1 %549 }
 0x426   : > { %854 = vlog2.f32 %v550_v30 }
 0x429   : > { %v552_v31 = vpop.xlane.xlu0 %551 }
 0x42a   : > { %856 = vlog2.f32 %v552_v31 }
 0x433   : > { %v855_v32 = vpop.eup %854 }
 0x434   : > { %v554_v33 = vmul.f32 0.6931472, %v855_v32 }
 0x436   : > { %v557_v34 = vadd.f32 %v554_v33, %v540_v22 }
 0x437   : > { %v857_v35 = vpop.eup %856 }
 0x438   : > { %v559_v36 = vsub.f32 %v533_v17, %v557_v34  ;;  %v556_v37 = vmul.f32 0.6931472, %v857_v35 }
 0x43a   : > { %561 = vst [vmem:[%s219_s5] sm:$0xff] %v559_v36  ;;  %v558_v38 = vadd.f32 %v556_v37, %v542_v25 }
 0x43c   : > { %v560_v39 = vsub.f32 %v536_v20, %v558_v38 }
 0x43e   : > { %562 = vst [vmem:[%s219_s5 + $0x8] sm:$0xff] %v560_v39 }
 0x43f   : > { %923 = shalt.err (!%p920_p1)
}
 0x440   : > { %s924_s14 = scalar_lea.hbm %s1168_s9, 256  ;;  %s928_s23 = scalar_lea.hbm %s1216_s4, 1024 }
 0x441   : > { %p925_p2 = scmp.ne.s32.totalorder %s1168_s9, %s924_s14  ;;  %p929_p5 = scmp.lt.s32.totalorder %s1168_s9, %s1216_s4 }
 0x442   : > { %p930_p6 = scmp.lt.s32.totalorder %s928_s23, %s924_s14 }
 0x443   : > { %p926_p3 = pnand %p925_p2, %p1229_p13 }
 0x444   : > { %p931_p10 = por %p930_p6, %p929_p5 }
 0x445   : > { %p927_p9 = pneg %p926_p3 }
 0x447   : > { %p932_p12 = pnand %p931_p10, %p927_p9 }
 0x449   : > { %935 = shalt.err (!%p932_p12)
}
 0x44a   : > { %s989_s29 = smov 128   ;;  %s990_s30 = smov 8  }
 0x44b   : > { %767 = dma.vmem_to_hbm [thread:$0]  (%p1229_p13), %s1170_s6, 256, %s1168_s9, %s1172_s10, %s989_s29, %s989_s29, %s990_s30  }
 0x44c PF: > { %p784_p4 = scmp.ge.s32.totalorder %s978_s18, 2  ;;  %s592_s5 = sand.u32 1, %s966_s15  }
 0x44d   : > { %p1230_p7 = scmp.ne.s32.totalorder %s1221_s26, 0  ;;  %s593_s7 = scalar_lea.sflag [#allocation4], %s592_s5 }
 0x44f   : > { %p777_p8 = pnand %p784_p4, %p1230_p7 }
 0x451   : > { %p778_p11 = pneg %p777_p8 }
 0x453   : > { %961 = dma.done.wait (%p778_p11), %s593_s7, 256  }
 0x454   : > { %963 = vsyncadd (%p778_p11), %s593_s7, 4294967040  ;;  %p16_p0 = scmp.ge.s32.totalorder %s1041_s21, 6   ;;  %s1231_s15 = smov %s970_s16 }
 0x455   : > { %s1232_s16 = smov %s974_s17  ;;  %s1233_s17 = smov %s1052_s24 }
 0x456   : > { %s1234_s18 = smov %s1041_s21  ;;  %18 = sbr.rel (!%p16_p0) target bundleno = 5 (0x5), region = 80 }
 0x45b   :  { %598 = vsyncpa [#allocation3], 1 }
 0x45c   :  { %600 = vsyncpa [#allocation3 + $0x1], 1 }
 0x45d   :  { %601 = vsyncpa [#allocation6], 1 }
 0x45e   :  { %602 = vsyncpa [#allocation4], 1 }
 0x45f   :  { %604 = vsyncpa [#allocation4 + $0x1], 1 }

</bundles_post_ra>
